<compile_context>
chip_gen: v6e
topology: v6e:2x2x1
jax: 0.10.0
libtpu: 0.0.40
codegen_flags: <defaults>
</compile_context>

<pallas_src>
import functools

import jax
import jax.numpy as jnp
from jax.experimental import pallas as pl
from jax.experimental.pallas import tpu as pltpu


def _soft_target_kernel(s_ref, t_ref, o_ref, *, inv_T: float, tile_rows: int,
                        batch: int, need_mask: bool):
    # One (TB, C) batch tile per grid step. Cast once to f32 (keeps bf16 /
    # low-precision transport on the HBM side of the DMA).
    s = s_ref[...].astype(jnp.float32) * inv_T
    t = t_ref[...].astype(jnp.float32) * inv_T

    # Student: stable log-softmax pieces (only s_shift and the per-row LSE).
    s_max = jnp.max(s, axis=1, keepdims=True)
    s_shift = s - s_max
    s_lse = jnp.log(jnp.sum(jnp.exp(s_shift), axis=1, keepdims=True))

    # Teacher: unnormalized exp and its per-row sum.
    t_max = jnp.max(t, axis=1, keepdims=True)
    t_shift = t - t_max
    t_exp = jnp.exp(t_shift)
    t_sum = jnp.sum(t_exp, axis=1, keepdims=True)

    # KL(p_t || p_s) summed over classes, refactored so that p_t and log_p_t
    # are never materialized and the only reciprocal is per-row (TB elements),
    # not per-element (TB*C).  Exact reciprocal: it is off the hot path and
    # keeps us inside the 1e-5 tolerance vs the reference.
    cross = jnp.sum(t_exp * (t_shift - s_shift), axis=1, keepdims=True)
    row_kl = cross * pl.reciprocal(t_sum, approx=False) + (s_lse - jnp.log(t_sum))

    if need_mask:
        # Mask rows past the global batch size (padded last tile reads
        # undefined data; every such row is self-contained and zeroed here).
        row0 = pl.program_id(0) * tile_rows
        rows = row0 + jax.lax.broadcasted_iota(jnp.int32, row_kl.shape, 0)
        row_kl = jnp.where(rows < batch, row_kl, jnp.float32(0.0))

    partial = jnp.sum(row_kl)

    # Lane-dense (1, 128) store: partial in lane 0, zeros elsewhere.  The
    # wrapper sums the whole (num_tiles, 128) output.
    lane = jax.lax.broadcasted_iota(jnp.int32, (1, o_ref.shape[1]), 1)
    o_ref[...] = jnp.where(lane == 0, partial, jnp.float32(0.0))


def _choose_batch_tile(B: int, C: int, itemsize: int) -> int:
    # 2 inputs x 2 pipeline buffers x TB x C x itemsize must stay well under
    # the smallest per-TC VMEM (v7x: 64 MiB).  Target <= 24 MiB of input
    # buffers, cap at 1024 rows, keep a multiple of 8 (sublane granularity).
    budget = 24 * 1024 * 1024
    per_row = 2 * 2 * C * itemsize
    tb = budget // max(per_row, 1)
    tb = min(tb, 1024, max(8, (B // 8) * 8))
    tb = max(8, (tb // 8) * 8)
    return tb


def soft_target_loss(out_s: jax.Array, out_t: jax.Array, T: float = 4.0) -> jax.Array:
    assert out_s.shape == out_t.shape and out_s.ndim == 2
    B, C = out_s.shape
    itemsize = jnp.dtype(out_s.dtype).itemsize

    tb = _choose_batch_tile(B, C, itemsize)
    num_tiles = pl.cdiv(B, tb)
    need_mask = (B % tb) != 0

    # Double-buffered input footprint; keep the scoped VMEM limit comfortably
    # above it but below v7x's 64 MiB physical VMEM.
    in_buf_bytes = 2 * 2 * tb * C * itemsize
    vmem_limit = int(min(48 * 1024 * 1024, max(16 * 1024 * 1024, 2 * in_buf_bytes)))

    kernel = functools.partial(
        _soft_target_kernel,
        inv_T=float(1.0 / T),
        tile_rows=tb,
        batch=B,
        need_mask=need_mask,
    )

    partials = pl.pallas_call(
        kernel,
        out_shape=jax.ShapeDtypeStruct((num_tiles, 128), jnp.float32),
        grid=(num_tiles,),
        in_specs=[
            pl.BlockSpec((tb, C), lambda i: (i, 0)),
            pl.BlockSpec((tb, C), lambda i: (i, 0)),
        ],
        out_specs=pl.BlockSpec((1, 128), lambda i: (i, 0)),
        compiler_params=pltpu.CompilerParams(
            dimension_semantics=("parallel",),
            vmem_limit_bytes=vmem_limit,
        ),
    )(out_s, out_t)

    # 'batchmean' uses the GLOBAL batch size; T^2 scale folded in here too.
    return jnp.sum(partials) * (float(T) * float(T) / B)


def _reference(out_s, out_t, T=4.0):
    log_p_s = jax.nn.log_softmax(out_s / T, axis=1)
    p_t = jax.nn.softmax(out_t / T, axis=1)
    log_p_t = jax.nn.log_softmax(out_t / T, axis=1)
    kl = p_t * (log_p_t - log_p_s)
    return jnp.sum(kl) / out_s.shape[0] * T * T


if __name__ == "__main__":
    key = jax.random.PRNGKey(0)

    # Main small test: 8 samples, 32-class logits (matches the PyTorch usage).
    k_s, k_t = jax.random.split(key)
    B, C = 8, 32
    out_s = jax.random.normal(k_s, (B, C), dtype=jnp.float32)
    out_t = jax.random.normal(k_t, (B, C), dtype=jnp.float32)

    loss = soft_target_loss(out_s, out_t, T=4.0)
    jax.block_until_ready(loss)
    ref = _reference(out_s, out_t, T=4.0)
    assert jnp.allclose(loss, ref, rtol=1e-5, atol=1e-5), (loss, ref)

    # Second test: non-multiple-of-tile batch + multi-tile grid, exercises the
    # padded-row mask and the global-batch 'batchmean' divisor.
    k_s2, k_t2 = jax.random.split(jax.random.PRNGKey(1))
    B2, C2 = 12, 160
    out_s2 = jax.random.normal(k_s2, (B2, C2), dtype=jnp.float32)
    out_t2 = jax.random.normal(k_t2, (B2, C2), dtype=jnp.float32)

    loss2 = soft_target_loss(out_s2, out_t2, T=2.0)
    jax.block_until_ready(loss2)
    ref2 = _reference(out_s2, out_t2, T=2.0)
    assert jnp.allclose(loss2, ref2, rtol=1e-5, atol=1e-5), (loss2, ref2)

    print("KERNEL_OK")
</pallas_src>

<mosaic_0001>
module attributes {stable_mosaic.version = 11 : i64} {
  func.func @_soft_target_kernel(%arg0: i32, %arg1: memref<8x32xf32, #tpu.memory_space<vmem>>, %arg2: memref<8x32xf32, #tpu.memory_space<vmem>>, %arg3: memref<1x128xf32, #tpu.memory_space<vmem>>) attributes {dimension_semantics = [#tpu.dimension_semantics<parallel>], iteration_bounds = array<i64: 1>, scalar_prefetch = 0 : i64, scratch_operands = 0 : i64, tpu.core_type = #tpu.core_type<tc>, window_params = [{transform_indices = @transform_0, window_bounds = array<i64: 8, 32>}, {transform_indices = @transform_1, window_bounds = array<i64: 8, 32>}, {transform_indices = @transform_2, window_bounds = array<i64: 1, 128>}]} {
    %c0 = arith.constant 0 : index
    %c0_0 = arith.constant 0 : index
    %0 = vector.load %arg1[%c0, %c0_0] : memref<8x32xf32, #tpu.memory_space<vmem>>, vector<8x32xf32>
    %cst = arith.constant 2.500000e-01 : f32
    %1 = vector.broadcast %cst : f32 to vector<8x32xf32>
    %2 = arith.mulf %0, %1 : vector<8x32xf32>
    %c0_1 = arith.constant 0 : index
    %c0_2 = arith.constant 0 : index
    %3 = vector.load %arg2[%c0_1, %c0_2] : memref<8x32xf32, #tpu.memory_space<vmem>>, vector<8x32xf32>
    %cst_3 = arith.constant 2.500000e-01 : f32
    %4 = vector.broadcast %cst_3 : f32 to vector<8x32xf32>
    %5 = arith.mulf %3, %4 : vector<8x32xf32>
    %cst_4 = arith.constant dense<0xFF800000> : vector<8xf32>
    %6 = vector.multi_reduction <maximumf>, %2, %cst_4 [1] : vector<8x32xf32> to vector<8xf32>
    %7 = vector.shape_cast %6 : vector<8xf32> to vector<8x1xf32>
    %8 = vector.broadcast %7 : vector<8x1xf32> to vector<8x32xf32>
    %9 = arith.subf %2, %8 : vector<8x32xf32>
    %10 = math.exp %9 : vector<8x32xf32>
    %cst_5 = arith.constant dense<0.000000e+00> : vector<8xf32>
    %11 = vector.multi_reduction <add>, %10, %cst_5 [1] : vector<8x32xf32> to vector<8xf32>
    %12 = vector.shape_cast %11 : vector<8xf32> to vector<8x1xf32>
    %13 = math.log %12 : vector<8x1xf32>
    %cst_6 = arith.constant dense<0xFF800000> : vector<8xf32>
    %14 = vector.multi_reduction <maximumf>, %5, %cst_6 [1] : vector<8x32xf32> to vector<8xf32>
    %15 = vector.shape_cast %14 : vector<8xf32> to vector<8x1xf32>
    %16 = vector.broadcast %15 : vector<8x1xf32> to vector<8x32xf32>
    %17 = arith.subf %5, %16 : vector<8x32xf32>
    %18 = math.exp %17 : vector<8x32xf32>
    %cst_7 = arith.constant dense<0.000000e+00> : vector<8xf32>
    %19 = vector.multi_reduction <add>, %18, %cst_7 [1] : vector<8x32xf32> to vector<8xf32>
    %20 = vector.shape_cast %19 : vector<8xf32> to vector<8x1xf32>
    %21 = arith.subf %17, %9 : vector<8x32xf32>
    %22 = arith.mulf %18, %21 : vector<8x32xf32>
    %cst_8 = arith.constant dense<0.000000e+00> : vector<8xf32>
    %23 = vector.multi_reduction <add>, %22, %cst_8 [1] : vector<8x32xf32> to vector<8xf32>
    %24 = vector.shape_cast %23 : vector<8xf32> to vector<8x1xf32>
    %25 = tpu.reciprocal %20 : vector<8x1xf32> -> vector<8x1xf32>
    %26 = arith.mulf %24, %25 : vector<8x1xf32>
    %27 = math.log %20 : vector<8x1xf32>
    %28 = arith.subf %13, %27 : vector<8x1xf32>
    %29 = arith.addf %26, %28 : vector<8x1xf32>
    %30 = vector.shape_cast %29 : vector<8x1xf32> to vector<1x8x1xf32>
    %cst_9 = arith.constant dense<0.000000e+00> : vector<1xf32>
    %31 = vector.multi_reduction <add>, %30, %cst_9 [1, 2] : vector<1x8x1xf32> to vector<1xf32>
    %32 = vector.shape_cast %31 : vector<1xf32> to vector<1x1x1xf32>
    %33 = vector.extract %32[0, 0, 0] : f32 from vector<1x1x1xf32>
    %34 = tpu.iota {dimensions = array<i32: 1>} : vector<1x128xi32>
    %c0_i32 = arith.constant 0 : i32
    %35 = vector.broadcast %c0_i32 : i32 to vector<1x128xi32>
    %36 = arith.cmpi eq, %34, %35 : vector<1x128xi32>
    %cst_10 = arith.constant 0.000000e+00 : f32
    %37 = vector.broadcast %33 : f32 to vector<1x128xf32>
    %38 = vector.broadcast %cst_10 : f32 to vector<1x128xf32>
    %39 = arith.select %36, %37, %38 : vector<1x128xi1>, vector<1x128xf32>
    %c0_11 = arith.constant 0 : index
    %c0_12 = arith.constant 0 : index
    %40 = vector.load %arg3[%c0_11, %c0_12] : memref<1x128xf32, #tpu.memory_space<vmem>>, vector<1x128xf32>
    tpu.vector_store %arg3[%c0_11, %c0_12], %39 {strides = array<i32>} : memref<1x128xf32, #tpu.memory_space<vmem>>, vector<1x128xf32>,
    return
  }
  func.func @transform_0(%arg0: i32) -> (i32, i32) {
    %c0_i32 = arith.constant 0 : i32
    %c0_i32_0 = arith.constant 0 : i32
    return %arg0, %c0_i32 : i32, i32
  }
  func.func @transform_1(%arg0: i32) -> (i32, i32) {
    %c0_i32 = arith.constant 0 : i32
    %c0_i32_0 = arith.constant 0 : i32
    return %arg0, %c0_i32 : i32, i32
  }
  func.func @transform_2(%arg0: i32) -> (i32, i32) {
    %c0_i32 = arith.constant 0 : i32
    %c0_i32_0 = arith.constant 0 : i32
    return %arg0, %c0_i32 : i32, i32
  }
}

</mosaic_0001>

<bundles_post_ra>
// kernel: tpu_custom_call.1
= control target key start
LH: loop header
LB: loop body
LE: loop exit
PB: predicated region body
PF: predicated region fallthrough
CT: control target
= control target key end

     0   :  { %7 = vsyncpa [#allocation3], 0  ;;  %s218_s0 = inlined_call_operand.hbm [shape: f32[8,32], index: 0, kind: input, shape index: {}]   ;;  %s219_s1 = inlined_call_operand.hbm [shape: f32[8,32], index: 1, kind: input, shape index: {}]   ;;  %s220_s2 = inlined_call_operand.hbm [shape: f32[1,128], index: 2, kind: output, shape index: {}]  }
   0x1   :  { %8 = vsyncpa [#allocation6], 0 }
   0x2   :  { %9 = vsyncpa [#allocation4], 0  ;;  %s186_s9 = smov [#allocation2]   ;;  %s187_s11 = smov [#allocation5]  }
   0x3   :  { %s16_s10 = sshll.u32 %s186_s9, 4  ;;  %s26_s12 = sshll.u32 %s187_s11, 4  ;;  %s17_s10 = int_to_ptr.vmem [resolvable:$true] %s16_s10  ;;  %s27_s12 = int_to_ptr.vmem [resolvable:$true] %s26_s12 }
   0x4   :  { %s128_s13 = scalar_lea.vmem %s17_s10, 128  ;;  %p133_p1 = scmp.lt.s32.totalorder %s17_s10, %s17_s10 }
   0x5   :  { %p129_p0 = scmp.ne.s32.totalorder %s17_s10, %s128_s13  ;;  %p134_p2 = scmp.lt.s32.totalorder %s128_s13, %s128_s13 }
   0x7   :  { %p135_p3 = por %p134_p2, %p133_p1 }
   0x9   :  { %p136_p4 = pnand %p135_p3, %p129_p0 }
   0xb   :  { %139 = shalt.err (!%p136_p4)
}
   0xc   :  { %19 = dma.hbm_to_vmem [thread:$0]  %s218_s0, 128, %s17_s10, [#allocation3]  }
   0xd   :  { %s148_s16 = scalar_lea.vmem %s27_s12, 128  ;;  %p153_p6 = scmp.lt.s32.totalorder %s27_s12, %s27_s12 }
   0xe   :  { %p149_p5 = scmp.ne.s32.totalorder %s27_s12, %s148_s16  ;;  %p154_p7 = scmp.lt.s32.totalorder %s148_s16, %s148_s16 }
  0x10   :  { %p155_p8 = por %p154_p7, %p153_p6 }
  0x12   :  { %p156_p9 = pnand %p155_p8, %p149_p5 }
  0x14   :  { %159 = shalt.err (!%p156_p9)
}
  0x15   :  { %29 = dma.hbm_to_vmem [thread:$0]  %s219_s1, 128, %s27_s12, [#allocation6]  }
  0x16   :  { %180 = dma.done.wait [#allocation3], 128  }
  0x17   :  { %181 = vsyncadd [#allocation3], 4294967168 }
  0x18   :  { %182 = dma.done.wait [#allocation6], 128  }
  0x19   :  { %183 = vsyncadd [#allocation6], 4294967168  ;;  %v36_v0 = vld [vmem:[#allocation2] sm:$0xff]  ;;  %vm40_vm0 = vcmask 261120   ;;  %v38_v1 = vld [vmem:[#allocation5] sm:$0xff]  ;;  %vm72_vm1 = vcmask 7168   ;;  %v83_v38 = vlaneseq }
  0x1a   :  { %v37_v2 = vmul.f32 0.25, %v36_v0  ;;  %v39_v3 = vmul.f32 0.25, %v38_v1  ;;  %s188_s0 = smov [#allocation7]  }
  0x1b   :  { %v84_v39 = vand.u32 127, %v83_v38  ;;  %s95_s1 = sshll.u32 %s188_s0, 4  ;;  %s96_s1 = int_to_ptr.vmem [resolvable:$true] %s95_s1 }
  0x1c   :  { %v41_v4 = vsel %vm40_vm0, %v37_v2, -inf  ;;  %v52_v5 = vsel %vm40_vm0, %v39_v3, -inf  ;;  %s160_s20 = scalar_lea.vmem %s96_s1, 16  ;;  %s164_s21 = scalar_lea.vmem %s96_s1, 32 }
  0x1d   :  { %42 = vmax.xlane.f32.xlu0 %v41_v4  ;;  %vm85_vm2 = vcmp.eq.s32.totalorder %v84_v39, 0  ;;  %p161_p10 = scmp.ne.s32.totalorder %s96_s1, %s160_s20  ;;  %p165_p11 = scmp.lt.s32.totalorder %s96_s1, %s96_s1 }
  0x1e   :  { %p166_p12 = scmp.lt.s32.totalorder %s164_s21, %s160_s20 }
  0x20   :  { %p167_p13 = por %p166_p12, %p165_p11 }
  0x21   :  { %53 = vmax.xlane.f32.xlu0 %v52_v5 }
  0x22   :  { %p168_p0 = pnand %p167_p13, %p161_p10 }
  0xa6   :  { %v43_v6 = vpop.xlane.xlu0 %42 }
  0xa7   :  { %v44_v7 = vsub.f32 %v37_v2, %v43_v6 }
  0xa9   :  { %v45_v8 = vmul.f32 1.442695, %v44_v7 }
  0xaa   :  { %v54_v9 = vpop.xlane.xlu0 %53 }
  0xab   :  { %110 = vpow2.f32 %v45_v8  ;;  %v55_v10 = vsub.f32 %v39_v3, %v54_v9 }
  0xad   :  { %v56_v11 = vmul.f32 1.442695, %v55_v10  ;;  %v61_v14 = vsub.f32 %v55_v10, %v44_v7 }
  0xaf   :  { %112 = vpow2.f32 %v56_v11 }
  0xb8   :  { %v111_v12 = vpop.eup %110 }
  0xb9   :  { %v47_v13 = vsel %vm40_vm0, %v111_v12, 0.0 }
  0xba   :  { %48 = vadd.xlane.f32.xlu1 %v47_v13 }
  0xbc   :  { %v113_v15 = vpop.eup %112 }
  0xbd   :  { %v58_v16 = vsel %vm40_vm0, %v113_v15, 0.0  ;;  %v62_v17 = vmul.f32 %v113_v15, %v61_v14 }
  0xbe   :  { %59 = vadd.xlane.f32.xlu1 %v58_v16 }
  0xbf   :  { %v63_v18 = vsel %vm40_vm0, %v62_v17, 0.0 }
  0xc0   :  { %64 = vadd.xlane.f32.xlu0 %v63_v18 }
 0x143   :  { %v49_v19 = vpop.xlane.xlu1 %48 }
 0x144   :  { %114 = vlog2.f32 %v49_v19 }
 0x147   :  { %v60_v20 = vpop.xlane.xlu1 %59 }
 0x148   :  { %116 = vrcp.f32 %v60_v20 }
 0x149   :  { %118 = vlog2.f32 %v60_v20  ;;  %v65_v26 = vpop.xlane.xlu0 %64 }
 0x151   :  { %v115_v21 = vpop.eup %114 }
 0x152   :  { %v51_v24 = vmul.f32 0.6931472, %v115_v21 }
 0x155   :  { %v117_v22 = vpop.eup %116 }
 0x156   :  { %v119_v23 = vpop.eup %118  ;;  %v67_v27 = vmul.f32 %v117_v22, %v65_v26 }
 0x157   :  { %v69_v25 = vmul.f32 0.6931472, %v119_v23 }
 0x159   :  { %v70_v28 = vsub.f32 %v51_v24, %v69_v25 }
 0x15b   :  { %v71_v29 = vadd.f32 %v70_v28, %v67_v27 }
 0x15d   :  { %v73_v30 = vsel %vm72_vm1, %v71_v29, 0.0 }
 0x15e   :  { %74 = vadd.xlane.f32.xlu1 %v73_v30 }
 0x1e7   :  { %v75_v31 = vpop.xlane.xlu1 %74 }
 0x1e8   :  { %v76_v32 = vrot.slane %v75_v31, 4 }
 0x1ea   :  { %v77_v33 = vadd.f32 %v76_v32, %v75_v31 }
 0x1ec   :  { %v78_v34 = vrot.slane %v77_v33, 2 }
 0x1ee   :  { %v79_v35 = vadd.f32 %v78_v34, %v77_v33 }
 0x1f0   :  { %v80_v36 = vrot.slane %v79_v35, 1 }
 0x1f2   :  { %v81_v37 = vadd.f32 %v80_v36, %v79_v35 }
 0x1f4   :  { %105 = vpush %v81_v37 }
 0x225   :  { %s106_s19 = spop %105 }
 0x226   :  { %v86_v40 = vstv %s106_s19 }
 0x227   :  { %v87_v41 = vsel %vm85_vm2, %v86_v40, 0.0 }
 0x228   :  { %88 = vst [vmem:[#allocation7] sm:$0x1] %v87_v41 }
 0x229   :  { %171 = shalt.err (!%p168_p0)
}
 0x22a   :  { %98 = dma.vmem_to_hbm [thread:$0]  %s96_s1, 16, %s220_s2, [#allocation4]  }
 0x22b   :  { %184 = dma.done.wait [#allocation4], 16  }
 0x22c   :  { %185 = vsyncadd [#allocation4], 4294967280 }
 0x22d   :  { %102 = vsyncpa [#allocation3], 1 }
 0x22e   :  { %103 = vsyncpa [#allocation6], 1 }
 0x22f   :  { %104 = vsyncpa [#allocation4], 1 }

</bundles_post_ra>
